<compile_context>
chip_gen: v6e
topology: v6e:2x2x1
jax: 0.10.0
libtpu: 0.0.40
codegen_flags: <defaults>
</compile_context>

<pallas_src>
import jax
import jax.numpy as jnp
from jax.experimental import pallas as pl
from jax.experimental.pallas import tpu as pltpu


def _ceil_to(x, m):
    return ((x + m - 1) // m) * m


def _pad2d(a, rows, cols):
    r, c = a.shape
    if r == rows and c == cols:
        return a
    return jnp.pad(a, ((0, rows - r), (0, cols - c)))


def _sublane_granule(dtype):
    # 8 sublanes x sub-32-bit packing factor (f32 -> 8, bf16 -> 16, int8 -> 32).
    return 8 * max(1, 4 // jnp.dtype(dtype).itemsize)


def _vmem_capacity_bytes():
    try:
        return int(pltpu.get_tpu_info().vmem_capacity_bytes)
    except Exception:
        return 64 << 20  # conservative fallback: v7x physical per-TC VMEM


def _pick_tile(padded, preferred):
    """Largest multiple-of-128 tile <= preferred that divides `padded`."""
    t = min(preferred, padded)
    t -= t % 128
    t = max(t, 128)
    while padded % t != 0:
        t -= 128
    return t


# --------------------------------------------------------------------------
# Kernels
# --------------------------------------------------------------------------
def _proj_kernel(x_ref, w_ref, b_ref, o_ref):
    """One (tm, tn) output tile, full K reduction in a single MXU block."""
    acc = jnp.dot(x_ref[...], w_ref[...], preferred_element_type=jnp.float32)
    o_ref[...] = (acc + b_ref[...]).astype(o_ref.dtype)


def _proj_kernel_ksplit(x_ref, w_ref, b_ref, o_ref, acc_ref):
    """K-split variant: bias-seeded f32 accumulator, cast+store at last k."""
    k = pl.program_id(3)

    @pl.when(k == 0)
    def _init():
        acc_ref[...] = jnp.broadcast_to(b_ref[...], acc_ref.shape)

    acc_ref[...] += jnp.dot(x_ref[...], w_ref[...],
                            preferred_element_type=jnp.float32)

    @pl.when(k == pl.num_programs(3) - 1)
    def _finalize():
        o_ref[...] = acc_ref[...].astype(o_ref.dtype)


# --------------------------------------------------------------------------
# Stacked projection: y[p] = x[p] @ w[p] + b[p] for P independent projections
# --------------------------------------------------------------------------
def _stacked_projection(x, w, b, *, tm, tn, tk, out_dtype, vmem_limit):
    """x: (P, Mp, Kp) compute dtype, w: (P, Kp, Np) compute dtype,
    b: (P, 1, Np) float32.  All dims pre-padded to tile multiples."""
    P, Mp, Kp = x.shape
    Np = w.shape[2]

    flops = 2 * P * Mp * Kp * Np
    bytes_accessed = (x.size * x.dtype.itemsize + w.size * w.dtype.itemsize
                      + b.size * 4 + P * Mp * Np * jnp.dtype(out_dtype).itemsize)
    cost = pl.CostEstimate(flops=flops, transcendentals=0,
                           bytes_accessed=bytes_accessed)

    if tk >= Kp:
        # Whole reduction in one block: pure parallel 3-D grid, no scratch.
        grid = (P, Mp // tm, Np // tn)
        kernel = _proj_kernel
        in_specs = [
            pl.BlockSpec((None, tm, Kp), lambda p, i, j: (p, i, 0)),
            pl.BlockSpec((None, Kp, tn), lambda p, i, j: (p, 0, j)),
            pl.BlockSpec((None, 1, tn), lambda p, i, j: (p, 0, j)),
        ]
        out_specs = pl.BlockSpec((None, tm, tn), lambda p, i, j: (p, i, j))
        scratch = []
        dims = ("parallel", "parallel", "parallel")
    else:
        grid = (P, Mp // tm, Np // tn, Kp // tk)
        kernel = _proj_kernel_ksplit
        in_specs = [
            pl.BlockSpec((None, tm, tk), lambda p, i, j, k: (p, i, k)),
            pl.BlockSpec((None, tk, tn), lambda p, i, j, k: (p, k, j)),
            pl.BlockSpec((None, 1, tn), lambda p, i, j, k: (p, 0, j)),
        ]
        out_specs = pl.BlockSpec((None, tm, tn), lambda p, i, j, k: (p, i, j))
        scratch = [pltpu.VMEM((tm, tn), jnp.float32)]
        dims = ("parallel", "parallel", "parallel", "arbitrary")

    return pl.pallas_call(
        kernel,
        grid=grid,
        in_specs=in_specs,
        out_specs=out_specs,
        out_shape=jax.ShapeDtypeStruct((P, Mp, Np), out_dtype),
        scratch_shapes=scratch,
        compiler_params=pltpu.CompilerParams(
            dimension_semantics=dims,
            vmem_limit_bytes=vmem_limit),
        cost_estimate=cost,
    )(x, w, b)


# --------------------------------------------------------------------------
# Module wrapper
# --------------------------------------------------------------------------
class CLIPWithFeatureMappingPallas:
    """JAX/Pallas equivalent of the PyTorch CLIPWithFeatureMapping module.

    Linear mapper weights are stored pre-transposed as [in_dim, out_dim],
    pre-padded to lane-dense tiles and pre-cast to the MXU compute dtype at
    construction time (no per-call weight pad/cast HBM traffic).
    """
    # TODO(synk): the wrapped clip_model is held but never used in forward(),
    # so it is intentionally not materialized here.

    def __init__(self, text_w, text_b, image_w, image_b, *,
                 compute_dtype=jnp.bfloat16, out_dtype=None,
                 tm=512, tn=512, max_k_block=2048):
        self.compute_dtype = jnp.dtype(compute_dtype)
        self.out_dtype = out_dtype
        self.tm_pref = tm
        self.tn_pref = tn
        self.max_k_block = max_k_block
        self.vmem_cap = _vmem_capacity_bytes()

        text_w = jnp.asarray(text_w)
        image_w = jnp.asarray(image_w)
        self.Kt, self.Nt = text_w.shape
        self.Ki, self.Ni = image_w.shape

        Kpt, Kpi = _ceil_to(self.Kt, 128), _ceil_to(self.Ki, 128)
        Npt, Npi = _ceil_to(self.Nt, 128), _ceil_to(self.Ni, 128)

        # Fuse both projections into one stacked call when the padded dims
        # coincide; otherwise keep per-projection padded K/N (no wasted work).
        self.fused = (Kpt == Kpi) and (Npt == Npi)
        if self.fused:
            self._groups = [self._make_group([text_w, image_w],
                                             [text_b, image_b], Kpt, Npt)]
        else:
            self._groups = [self._make_group([text_w], [text_b], Kpt, Npt),
                            self._make_group([image_w], [image_b], Kpi, Npi)]

    def _make_group(self, ws, bs, Kp, Np):
        tn = _pick_tile(Np, self.tn_pref)
        tk = Kp if Kp <= self.max_k_block else _pick_tile(Kp, 1024)
        w = jnp.stack([_pad2d(jnp.asarray(wi), Kp, Np).astype(self.compute_dtype)
                       for wi in ws])
        b = jnp.stack([_pad2d(jnp.asarray(bi).reshape(1, -1).astype(jnp.float32),
                              1, Np)
                       for bi in bs])
        return dict(w=w, b=b, Kp=Kp, Np=Np, tn=tn, tk=tk)

    def _run_group(self, grp, xs, M, out_dtype):
        Kp, Np, tn, tk = grp["Kp"], grp["Np"], grp["tn"], grp["tk"]
        in_b = self.compute_dtype.itemsize
        out_b = jnp.dtype(out_dtype).itemsize
        g = _sublane_granule(self.compute_dtype)

        tm = max(g, min(_ceil_to(self.tm_pref, g), _ceil_to(M, g)))
        kblk = min(tk, Kp)

        def step_bytes(tm_):
            # Double-buffered pipeline tiles (+ resident f32 acc if K is split).
            s = 2 * (tm_ * kblk * in_b + kblk * tn * in_b + tn * 4
                     + tm_ * tn * out_b)
            if tk < Kp:
                s += tm_ * tn * 4
            return s

        # Shrink tm if a user-supplied tile would blow ~40% of chip VMEM.
        while tm > g and step_bytes(tm) > (self.vmem_cap * 2) // 5:
            tm = max(g, (tm // 2 // g) * g)

        Mp = _ceil_to(M, tm)
        vmem_limit = int(min(self.vmem_cap,
                             max(32 << 20, int(1.5 * step_bytes(tm)))))

        x = jnp.stack([_pad2d(xi, Mp, Kp).astype(self.compute_dtype)
                       for xi in xs])
        return _stacked_projection(x, grp["w"], grp["b"],
                                   tm=tm, tn=tn, tk=tk,
                                   out_dtype=out_dtype,
                                   vmem_limit=vmem_limit)

    def __call__(self, text_features, image_features):
        M = text_features.shape[0]
        assert image_features.shape[0] == M, "text / image batch must match"
        assert text_features.shape[1] == self.Kt
        assert image_features.shape[1] == self.Ki
        out_dtype = self.out_dtype or text_features.dtype

        if self.fused:
            y = self._run_group(self._groups[0],
                                [text_features, image_features], M, out_dtype)
            return y[0, :M, :self.Nt], y[1, :M, :self.Ni]

        yt = self._run_group(self._groups[0], [text_features], M, out_dtype)
        yi = self._run_group(self._groups[1], [image_features], M, out_dtype)
        return yt[0, :M, :self.Nt], yi[0, :M, :self.Ni]


if __name__ == "__main__":
    # Small deterministic shapes consistent with the module's forward:
    #   text_features:  [batch, text_dim]
    #   image_features: [batch, image_dim]
    batch = 2
    text_dim = 32
    image_dim = 64
    out_dim = 32

    key = jax.random.PRNGKey(0)
    k1, k2, k3, k4, k5, k6 = jax.random.split(key, 6)

    text_features = jax.random.normal(k1, (batch, text_dim), jnp.float32)
    image_features = jax.random.normal(k2, (batch, image_dim), jnp.float32)

    text_w = jax.random.normal(k3, (text_dim, out_dim), jnp.float32) * 0.02
    text_b = jax.random.normal(k4, (out_dim,), jnp.float32) * 0.01
    image_w = jax.random.normal(k5, (image_dim, out_dim), jnp.float32) * 0.02
    image_b = jax.random.normal(k6, (out_dim,), jnp.float32) * 0.01

    ref_text = text_features @ text_w + text_b
    ref_image = image_features @ image_w + image_b

    # --- f32 MXU operands (accuracy path, fused stacked grid, P=2) ---------
    model_f32 = CLIPWithFeatureMappingPallas(
        text_w, text_b, image_w, image_b, compute_dtype=jnp.float32)
    fwd_f32 = jax.jit(lambda t, i: model_f32(t, i))
    mapped_text, mapped_image = fwd_f32(text_features, image_features)
    jax.block_until_ready((mapped_text, mapped_image))

    assert mapped_text.shape == (batch, out_dim)
    assert mapped_image.shape == (batch, out_dim)
    assert jnp.allclose(mapped_text, ref_text, atol=1e-4, rtol=1e-4)
    assert jnp.allclose(mapped_image, ref_image, atol=1e-4, rtol=1e-4)

    # --- bf16 MXU operands (default fast path), f32 accumulate + epilogue --
    model_bf16 = CLIPWithFeatureMappingPallas(text_w, text_b, image_w, image_b)
    fwd_bf16 = jax.jit(lambda t, i: model_bf16(t, i))
    mt_bf16, mi_bf16 = fwd_bf16(text_features, image_features)
    jax.block_until_ready((mt_bf16, mi_bf16))

    assert jnp.allclose(mt_bf16, ref_text, atol=5e-2, rtol=5e-2)
    assert jnp.allclose(mi_bf16, ref_image, atol=5e-2, rtol=5e-2)

    # --- Asymmetric dims -> per-projection padded K/N path (two calls) -----
    j1, j2, j3, j4 = jax.random.split(jax.random.PRNGKey(1), 4)
    img_dim2, out_t2, out_i2 = 200, 32, 160
    image_feats2 = jax.random.normal(j1, (batch, img_dim2), jnp.float32)
    image_w2 = jax.random.normal(j2, (img_dim2, out_i2), jnp.float32) * 0.02
    image_b2 = jax.random.normal(j3, (out_i2,), jnp.float32) * 0.01
    text_w2 = jax.random.normal(j4, (text_dim, out_t2), jnp.float32) * 0.02
    text_b2 = jnp.zeros((out_t2,), jnp.float32)

    model_asym = CLIPWithFeatureMappingPallas(
        text_w2, text_b2, image_w2, image_b2, compute_dtype=jnp.float32)
    at, ai = jax.jit(lambda t, i: model_asym(t, i))(text_features, image_feats2)
    jax.block_until_ready((at, ai))

    assert at.shape == (batch, out_t2) and ai.shape == (batch, out_i2)
    assert jnp.allclose(at, text_features @ text_w2 + text_b2,
                        atol=1e-4, rtol=1e-4)
    assert jnp.allclose(ai, image_feats2 @ image_w2 + image_b2,
                        atol=1e-4, rtol=1e-4)

    print("KERNEL_OK")
</pallas_src>

<mosaic_0001>
module attributes {stable_mosaic.version = 11 : i64} {
  func.func @_proj_kernel(%arg0: i32, %arg1: i32, %arg2: i32, %arg3: memref<1x8x128xf32, #tpu.memory_space<vmem>>, %arg4: memref<1x128x128xf32, #tpu.memory_space<vmem>>, %arg5: memref<1x1x128xf32, #tpu.memory_space<vmem>>, %arg6: memref<1x8x128xf32, #tpu.memory_space<vmem>>) attributes {dimension_semantics = [#tpu.dimension_semantics<parallel>, #tpu.dimension_semantics<parallel>, #tpu.dimension_semantics<parallel>], iteration_bounds = array<i64: 2, 1, 1>, scalar_prefetch = 0 : i64, scratch_operands = 0 : i64, tpu.core_type = #tpu.core_type<tc>, window_params = [{transform_indices = @transform_0, window_bounds = array<i64: 1, 8, 128>}, {transform_indices = @transform_1, window_bounds = array<i64: 1, 128, 128>}, {transform_indices = @transform_2, window_bounds = array<i64: 1, 1, 128>}, {transform_indices = @transform_3, window_bounds = array<i64: 1, 8, 128>}]} {
    %c0 = arith.constant 0 : index
    %c0_0 = arith.constant 0 : index
    %c0_1 = arith.constant 0 : index
    %0 = vector.load %arg3[%c0, %c0_0, %c0_1] : memref<1x8x128xf32, #tpu.memory_space<vmem>>, vector<1x8x128xf32>
    %1 = vector.shape_cast %0 : vector<1x8x128xf32> to vector<8x128xf32>
    %c0_2 = arith.constant 0 : index
    %c0_3 = arith.constant 0 : index
    %c0_4 = arith.constant 0 : index
    %2 = vector.load %arg4[%c0_2, %c0_3, %c0_4] : memref<1x128x128xf32, #tpu.memory_space<vmem>>, vector<1x128x128xf32>
    %3 = vector.shape_cast %2 : vector<1x128x128xf32> to vector<128x128xf32>
    %cst = arith.constant dense<0.000000e+00> : vector<8x128xf32>
    %4 = tpu.matmul %1, %3, %cst {dimension_numbers = #tpu.dot_dimension_numbers<[1], [0], [0], [1], [0, 0, 1, 1], [], []>} : vector<8x128xf32>, vector<128x128xf32>, vector<8x128xf32> -> vector<8x128xf32>
    %c0_5 = arith.constant 0 : index
    %c0_6 = arith.constant 0 : index
    %c0_7 = arith.constant 0 : index
    %5 = vector.load %arg5[%c0_5, %c0_6, %c0_7] : memref<1x1x128xf32, #tpu.memory_space<vmem>>, vector<1x1x128xf32>
    %6 = vector.shape_cast %5 : vector<1x1x128xf32> to vector<1x128xf32>
    %7 = vector.broadcast %6 : vector<1x128xf32> to vector<8x128xf32>
    %8 = arith.addf %4, %7 : vector<8x128xf32>
    %c0_8 = arith.constant 0 : index
    %c0_9 = arith.constant 0 : index
    %c0_10 = arith.constant 0 : index
    %9 = vector.load %arg6[%c0_8, %c0_9, %c0_10] : memref<1x8x128xf32, #tpu.memory_space<vmem>>, vector<1x8x128xf32>
    %10 = vector.shape_cast %9 : vector<1x8x128xf32> to vector<8x128xf32>
    %11 = vector.shape_cast %8 : vector<8x128xf32> to vector<1x8x128xf32>
    tpu.vector_store %arg6[%c0_8, %c0_9, %c0_10], %11 {strides = array<i32>} : memref<1x8x128xf32, #tpu.memory_space<vmem>>, vector<1x8x128xf32>,
    return
  }
  func.func @transform_0(%arg0: i32, %arg1: i32, %arg2: i32) -> (i32, i32, i32) {
    %c0_i32 = arith.constant 0 : i32
    %c0_i32_0 = arith.constant 0 : i32
    return %arg0, %arg1, %c0_i32 : i32, i32, i32
  }
  func.func @transform_1(%arg0: i32, %arg1: i32, %arg2: i32) -> (i32, i32, i32) {
    %c0_i32 = arith.constant 0 : i32
    %c0_i32_0 = arith.constant 0 : i32
    return %arg0, %c0_i32, %arg2 : i32, i32, i32
  }
  func.func @transform_2(%arg0: i32, %arg1: i32, %arg2: i32) -> (i32, i32, i32) {
    %c0_i32 = arith.constant 0 : i32
    %c0_i32_0 = arith.constant 0 : i32
    return %arg0, %c0_i32, %arg2 : i32, i32, i32
  }
  func.func @transform_3(%arg0: i32, %arg1: i32, %arg2: i32) -> (i32, i32, i32) {
    %c0_i32 = arith.constant 0 : i32
    return %arg0, %arg1, %arg2 : i32, i32, i32
  }
}

</mosaic_0001>

<bundles_post_ra>
// kernel: _lambda_.1
= control target key start
LH: loop header
LB: loop body
LE: loop exit
PB: predicated region body
PF: predicated region fallthrough
CT: control target
= control target key end

     0   :  { %8 = vsyncpa [#allocation3], 0  ;;  %s851_s0 = inlined_call_operand.vmem [shape: f32[2,8,128], index: 0, kind: input, shape index: {}]   ;;  %s852_s1 = inlined_call_operand.hbm [shape: f32[2,128,128], index: 1, kind: input, shape index: {}]   ;;  %s853_s2 = inlined_call_operand.vmem [shape: f32[2,1,128], index: 2, kind: input, shape index: {}]   ;;  %s854_s3 = inlined_call_operand.vmem [shape: f32[2,8,128], index: 3, kind: output, shape index: {}]  }
   0x1   :  { %10 = vsyncpa [#allocation3 + $0x1], 0  ;;  %s731_s12 = smov 0   ;;  %s733_s13 = smov 0  }
   0x2   :  { %s735_s14 = smov 0   ;;  %s737_s15 = smov 0  }
   0x3   :  { %s739_s16 = smov 0   ;;  %s741_s17 = smov 0  }
   0x4 LB: > { %s500_s18 = sadd.s32 4294967295, %s704_s17   ;;  %s35_s19 = sadd.s32 1, %s700_s16  ;;  %s704_s17 = sphi %s741_s17, %s16_s17   ;;  %s700_s16 = sphi %s739_s16, %s862_s16   ;;  %s696_s15 = sphi %s737_s15, %s861_s15   ;;  %s692_s14 = sphi %s735_s14, %s860_s14   ;;  %s688_s13 = sphi %s733_s13, %s859_s13   ;;  %s684_s12 = sphi %s731_s12, %s858_s12  }
   0x5   : > { %p37_p0 = scmp.ge.s32.totalorder %s35_s19, 2  ;;  %s72_s20 = sadd.s32 1, %s692_s14 }
   0x6   : > { %p79_p1 = scmp.ne.s32.totalorder %s692_s14, %s688_s13  ;;  %p80_p2 = scmp.eq.s32.totalorder %s704_s17, 0 }
   0x7   : > { %s864_s19 = smov (%p37_p0, %s35_s19), 0  ;;  %p85_p4 = scmp.ne.s32.totalorder %s688_s13, %s684_s12 }
   0x8   : > { %p767_p3 = por %p80_p2, %p79_p1  ;;  %s67_s22 = ssub.s32 %s700_s16, %s864_s19 }
   0x9   : > { %p86_p5 = scmp.eq.s32.totalorder %s500_s18, 0  ;;  %p70_p6 = scmp.eq.s32.totalorder %s67_s22, 0 }
   0xa   : > { %p573_p8 = scmp.lt.s32.totalorder %s704_s17, 2  ;;  %s177_s25 = sand.u32 1, %s692_s14  }
   0xb   : > { %p774_p7 = por %p86_p5, %p85_p4  ;;  %s514_s26 = sshll.u32 %s700_s16, 11 }
   0xc   : > { %s780_s24 = scalar_select %p70_p6, %s692_s14, %s72_s20  }
   0xd   : > { %s504_s27 = sshll.u32 %s177_s25, 7  ;;  %s188_s30 = scalar_lea.hbm %s852_s1, %s514_s26 }
   0xe   : > { %s181_s4 = scalar_lea.vmem [#allocation2], %s504_s27  ;;  %p789_p9 = pnand %p573_p8, %p767_p3 }
   0xf   : > { %s189_s5 = sshll.u32 %s181_s4, 4  ;;  %s178_s7 = scalar_lea.sflag [#allocation3], %s177_s25  ;;  %s190_s5 = int_to_ptr.vmem [resolvable:$true] %s189_s5 }
  0x10   : > { %p628_p10 = pneg %p789_p9  ;;  %s639_s8 = scalar_lea.vmem %s190_s5, 2048 }
  0x11   : > { %p640_p11 = scmp.ne.s32.totalorder %s190_s5, %s639_s8  ;;  %s706_s9 = smov [#allocation2]  }
  0x12   : > { %s644_s10 = sshll.u32 %s706_s9, 4  ;;  %s645_s10 = int_to_ptr.vmem [resolvable:$false] %s644_s10 }
  0x13   : > { %p642_p12 = pnand %p640_p11, %p628_p10  ;;  %s646_s11 = scalar_lea.vmem %s645_s10, 4096 }
  0x14   : > { %p647_p0 = scmp.lt.s32.totalorder %s190_s5, %s645_s10  ;;  %p648_p1 = scmp.lt.s32.totalorder %s646_s11, %s639_s8 }
  0x15   : > { %p643_p13 = pneg %p642_p12 }
  0x16   : > { %p649_p2 = por %p648_p1, %p647_p0 }
  0x18   : > { %p650_p3 = pnand %p649_p2, %p643_p13 }
  0x1a   : > { %653 = shalt.err (!%p650_p3)
}
  0x1b   : > { %s707_s12 = smov 128   ;;  %s708_s18 = smov 8  }
  0x1c   : > { %572 = dma.hbm_to_vmem [thread:$0]  (!%p789_p9), %s188_s30, 2048, %s190_s5, %s178_s7, %s707_s12, %s707_s12, %s708_s18  }
  0x1d   : > { %p507_p4 = scmp.ge.s32.totalorder %s704_s17, 1  ;;  %p206_p5 = scmp.lt.s32.totalorder %s704_s17, 3 }
  0x1f   : > { %p207_p6 = pnand %p507_p4, %p206_p5 }
  0x20   : > { %s212_s20 = sand.u32 (!%p207_p6), 1, %s688_s13  }
  0x21   : > { %210 = sbr.rel (%p207_p6) target bundleno = 268 (0x10c), region = 32  ;;  %s508_s21 = sshll.u32 (!%p207_p6), %s212_s20, 7 }
  0x22   : > { %s213_s22 = scalar_lea.sflag (!%p207_p6), [#allocation3], %s212_s20  ;;  %s800_s25 = scalar_lea.vmem (!%p207_p6), [#allocation2], %s508_s21 }
  0x26   : > { %679 = dma.done.wait (%p774_p7), %s213_s22, 2048  }
  0x27   : > { %681 = vsyncadd (%p774_p7), %s213_s22, 4294965248  ;;  %v709_v0 = vmov 0.0   ;;  %vm710_vm0 = vmmov 0   ;;  %v296_v1 = vld [vmem:[%s800_s25 + $0x78] sm:$0xff]  ;;  %v295_v2 = vld [vmem:[%s800_s25 + $0x70] sm:$0xff]  ;;  %p257_p7 = scmp.lt.s32.totalorder %s696_s15, 1 }
  0x28   : > { %532 = vmatprep.subr.mxu0 %v709_v0  ;;  %564 = vmatprep.mubr.msk.f32.mxu0 %vm710_vm0, %v709_v0  ;;  %v294_v3 = vld [vmem:[%s800_s25 + $0x68] sm:$0xff]  ;;  %v293_v4 = vld [vmem:[%s800_s25 + $0x60] sm:$0xff]  ;;  %v292_v5 = vld [vmem:[%s800_s25 + $0x58] sm:$0xff] }
  0x29   : > { %533 = vmatpush3.msra.mxu0 %v296_v1  ;;  %v291_v6 = vld [vmem:[%s800_s25 + $0x50] sm:$0xff]  ;;  %v290_v7 = vld [vmem:[%s800_s25 + $0x48] sm:$0xff]  ;;  %v289_v8 = vld [vmem:[%s800_s25 + $0x40] sm:$0xff]  ;;  %s866_s15 = smov (!%p257_p7, %s696_s15), 1 }
  0x2a   : > { %534 = vmatprep.subr.mxu0 %v709_v0  ;;  %v288_v9 = vld [vmem:[%s800_s25 + $0x38] sm:$0xff]  ;;  %v287_v10 = vld [vmem:[%s800_s25 + $0x30] sm:$0xff]  ;;  %v286_v11 = vld [vmem:[%s800_s25 + $0x28] sm:$0xff]  ;;  %s509_s23 = sshll.u32 %s866_s15, 3  ;;  %s269_s4 = scalar_lea.vmem %s853_s2, %s866_s15 }
  0x2b   : > { %535 = vmatpush3.msra.mxu0 %v295_v2  ;;  %v285_v12 = vld [vmem:[%s800_s25 + $0x20] sm:$0xff]  ;;  %v284_v13 = vld [vmem:[%s800_s25 + $0x18] sm:$0xff]  ;;  %v283_v14 = vld [vmem:[%s800_s25 + $0x10] sm:$0xff]  ;;  %s263_s28 = scalar_lea.vmem %s851_s0, %s509_s23  ;;  %s279_s7 = scalar_lea.vmem %s854_s3, %s509_s23 }
  0x2c   : > { %536 = vmatprep.subr.mxu0 %v709_v0  ;;  %v282_v15 = vld [vmem:[%s800_s25 + $0x8] sm:$0xff]  ;;  %v281_v16 = vld [vmem:[%s800_s25] sm:$0xff] }
  0x2d   : > { %537 = vmatpush3.msra.mxu0 %v294_v3  ;;  %v280_v17 = vld [vmem:[%s263_s28] sm:$0xff] }
  0x2e   : > { %538 = vmatprep.subr.mxu0 %v709_v0  ;;  %v511_v18 = vld [vmem:[%s269_s4] ss:$0 sm:$0xff] }
  0x2f   : > { %539 = vmatpush3.msra.mxu0 %v293_v4 }
  0x30   : > { %540 = vmatprep.subr.mxu0 %v709_v0 }
  0x31   : > { %541 = vmatpush3.msra.mxu0 %v292_v5 }
  0x32   : > { %542 = vmatprep.subr.mxu0 %v709_v0 }
  0x33   : > { %543 = vmatpush3.msra.mxu0 %v291_v6 }
  0x34   : > { %544 = vmatprep.subr.mxu0 %v709_v0 }
  0x35   : > { %545 = vmatpush3.msra.mxu0 %v290_v7 }
  0x36   : > { %546 = vmatprep.subr.mxu0 %v709_v0 }
  0x37   : > { %547 = vmatpush3.msra.mxu0 %v289_v8 }
  0x38   : > { %548 = vmatprep.subr.mxu0 %v709_v0 }
  0x39   : > { %549 = vmatpush3.msra.mxu0 %v288_v9 }
  0x3a   : > { %550 = vmatprep.subr.mxu0 %v709_v0 }
  0x3b   : > { %551 = vmatpush3.msra.mxu0 %v287_v10 }
  0x3c   : > { %552 = vmatprep.subr.mxu0 %v709_v0 }
  0x3d   : > { %553 = vmatpush3.msra.mxu0 %v286_v11 }
  0x3e   : > { %554 = vmatprep.subr.mxu0 %v709_v0 }
  0x3f   : > { %555 = vmatpush3.msra.mxu0 %v285_v12 }
  0x40   : > { %556 = vmatprep.subr.mxu0 %v709_v0 }
  0x41   : > { %557 = vmatpush3.msra.mxu0 %v284_v13 }
  0x42   : > { %558 = vmatprep.subr.mxu0 %v709_v0 }
  0x43   : > { %559 = vmatpush3.msra.mxu0 %v283_v14 }
  0x44   : > { %560 = vmatprep.subr.mxu0 %v709_v0 }
  0x45   : > { %561 = vmatpush3.msra.mxu0 %v282_v15 }
  0x46   : > { %562 = vmatprep.subr.mxu0 %v709_v0 }
  0x47   : > { %563 = vmatpush3.msra.mxu0 %v281_v16 }
  0x48   : > { %565 = vmatmul.mubr.f32.vlgmr.msra.gmra.mxu0 %v280_v17 }
 0x108   : > { %v370_v19 = vpop.f32.mrf.mxu0 }
 0x109   : > { %v371_v20 = vadd.f32 %v511_v18, %v370_v19 }
 0x10a   : > { %v566_v21 = vpop.f32.mrf.mxu0 }
 0x10b   : > { %374 = vst [vmem:[%s279_s7] sm:$0xff] %v371_v20 }
 0x10c PF: > { %s16_s17 = sadd.s32 1, %s704_s17   ;;  %s858_s12 = smov %s688_s13 }
 0x10d   : > { %p13_p8 = scmp.ge.s32.totalorder %s16_s17, 4   ;;  %s859_s13 = smov %s692_s14 }
 0x10e   : > { %s860_s14 = smov %s780_s24  ;;  %s861_s15 = smov %s700_s16 }
 0x10f   : > { %s862_s16 = smov %s864_s19  ;;  %15 = sbr.rel (!%p13_p8) target bundleno = 4 (0x4), region = 78 }
 0x114   :  { %406 = vsyncpa [#allocation3], 1 }
 0x115   :  { %408 = vsyncpa [#allocation3 + $0x1], 1 }

</bundles_post_ra>
